<compile_context>
chip_gen: v7x
topology: tpu7x:2x2x1
jax: 0.10.0
libtpu: 0.0.40
codegen_flags: <defaults>
</compile_context>

<pallas_src>
import functools

import jax
import jax.numpy as jnp
from jax.experimental import pallas as pl
from jax.experimental.pallas import tpu as pltpu


def _round_up(n: int, m: int) -> int:
    return ((n + m - 1) // m) * m


def _choose_block_b(B: int) -> int:
    """Batch block: big (DMA-efficient), but >=2 grid steps for large B (v7x megacore)."""
    if B <= 512:
        return B                                   # single step; block == full dim is legal
    bb = min(2048, _round_up(pl.cdiv(B, 2), 8))    # >=2 steps, 512..2048 rows each
    return max(bb, 512)


def _gated_transition_kernel(
    x_ref, h_ref, w_ih_ref, w_hh_ref, b_ih_ref, b_hh_ref, w_heads_ref, b_heads_ref,
    out_ref, *, z_dim: int, eps: float,
):
    Z = z_dim
    x = x_ref[...]                                 # (bb, D)
    h = h_ref[...]                                 # (bb, Z)

    # --- GRU cell: two small MXU pushes (K = D and K = Z), f32 accumulation ---
    gi = jnp.dot(x, w_ih_ref[...], preferred_element_type=jnp.float32) + b_ih_ref[...]
    gh = jnp.dot(h, w_hh_ref[...], preferred_element_type=jnp.float32) + b_hh_ref[...]

    r = jax.nn.sigmoid(gi[:, 0:Z] + gh[:, 0:Z])            # reset gate
    u = jax.nn.sigmoid(gi[:, Z:2 * Z] + gh[:, Z:2 * Z])    # update gate ("z" in torch docs)
    n = jnp.tanh(gi[:, 2 * Z:3 * Z] + r * gh[:, 2 * Z:3 * Z])
    h_new = (1.0 - u) * n + u * h                           # (bb, Z)

    # --- fused heads, padded to a lane-dense (bb, P) slab, P multiple of 128 ---
    heads = (
        jnp.dot(h_new, w_heads_ref[...], preferred_element_type=jnp.float32)
        + b_heads_ref[...]
    )                                              # lanes [0,Z)=mean, [Z,2Z)=log_std, rest pad

    # get_std applied via lane-mask select (no slice/concat); pad lanes are discarded.
    std_all = jnp.where(heads > 0.0, jnp.log1p(heads + eps) + 1.0, jnp.exp(heads))
    col = jax.lax.broadcasted_iota(jnp.int32, heads.shape, 1)
    out_ref[...] = jnp.where(col < Z, heads, std_all)


def gated_transition_forward(x, h, packed, *, input_dim, z_dim, block_b=None):
    """x: (B, input_dim), h: (B, z_dim). Returns (mean, std), each (B, z_dim)."""
    B = x.shape[0]
    D, Z = input_dim, z_dim
    P = packed["w_heads"].shape[1]                 # padded head lanes (multiple of 128)
    if block_b is None:
        block_b = _choose_block_b(B)

    kernel = functools.partial(_gated_transition_kernel, z_dim=Z, eps=1e-6)

    out = pl.pallas_call(
        kernel,
        out_shape=jax.ShapeDtypeStruct((B, P), jnp.float32),
        grid=(pl.cdiv(B, block_b),),
        in_specs=[
            pl.BlockSpec((block_b, D), lambda i: (i, 0)),       # x stream
            pl.BlockSpec((block_b, Z), lambda i: (i, 0)),       # h stream
            pl.BlockSpec((D, 3 * Z), lambda i: (0, 0)),         # W_ih^T (resident)
            pl.BlockSpec((Z, 3 * Z), lambda i: (0, 0)),         # W_hh^T (resident)
            pl.BlockSpec((1, 3 * Z), lambda i: (0, 0)),         # b_ih
            pl.BlockSpec((1, 3 * Z), lambda i: (0, 0)),         # b_hh
            pl.BlockSpec((Z, P), lambda i: (0, 0)),             # [W_mean^T | W_log_std^T | 0]
            pl.BlockSpec((1, P), lambda i: (0, 0)),             # [b_mean | b_log_std | 0]
        ],
        out_specs=pl.BlockSpec((block_b, P), lambda i: (i, 0)),
        compiler_params=pltpu.CompilerParams(dimension_semantics=("parallel",)),
    )(x, h, packed["w_ih_t"], packed["w_hh_t"], packed["b_ih"], packed["b_hh"],
      packed["w_heads"], packed["b_heads"])

    return out[:, :Z], out[:, Z:2 * Z]


def _init_params(key, input_dim, z_dim):
    """Torch-style uniform init; weights stored in torch layout (out_features, in_features)."""
    ks = jax.random.split(key, 8)
    bound = 1.0 / jnp.sqrt(jnp.float32(z_dim))

    def u(k, shape):
        return jax.random.uniform(k, shape, jnp.float32, -bound, bound)

    return {
        "w_ih": u(ks[0], (3 * z_dim, input_dim)),
        "w_hh": u(ks[1], (3 * z_dim, z_dim)),
        "b_ih": u(ks[2], (1, 3 * z_dim)),
        "b_hh": u(ks[3], (1, 3 * z_dim)),
        "w_mean": u(ks[4], (z_dim, z_dim)),
        "b_mean": u(ks[5], (1, z_dim)),
        "w_log_std": u(ks[6], (z_dim, z_dim)),
        "b_log_std": u(ks[7], (1, z_dim)),
    }


def _pack_params(p, input_dim, z_dim):
    """One-time host-side packing: transposes + lane-padded concatenated heads."""
    Z = z_dim
    P = _round_up(2 * Z, 128)                      # lane-dense output width
    w_heads = jnp.zeros((Z, P), jnp.float32)
    w_heads = w_heads.at[:, :Z].set(p["w_mean"].T)
    w_heads = w_heads.at[:, Z:2 * Z].set(p["w_log_std"].T)
    b_heads = jnp.zeros((1, P), jnp.float32)
    b_heads = b_heads.at[:, :Z].set(p["b_mean"])
    b_heads = b_heads.at[:, Z:2 * Z].set(p["b_log_std"])
    return {
        "w_ih_t": p["w_ih"].T,                     # (D, 3Z)
        "w_hh_t": p["w_hh"].T,                     # (Z, 3Z)
        "b_ih": p["b_ih"],
        "b_hh": p["b_hh"],
        "w_heads": w_heads,                        # (Z, P)
        "b_heads": b_heads,                        # (1, P)
    }


def _reference(x, h, p, z_dim, eps=1e-6):
    Z = z_dim
    gi = x @ p["w_ih"].T + p["b_ih"]
    gh = h @ p["w_hh"].T + p["b_hh"]
    r = jax.nn.sigmoid(gi[:, :Z] + gh[:, :Z])
    u = jax.nn.sigmoid(gi[:, Z:2 * Z] + gh[:, Z:2 * Z])
    n = jnp.tanh(gi[:, 2 * Z:] + r * gh[:, 2 * Z:])
    h_new = (1.0 - u) * n + u * h
    mean = h_new @ p["w_mean"].T + p["b_mean"]
    log_std = h_new @ p["w_log_std"].T + p["b_log_std"]
    std = jnp.where(log_std > 0, jnp.log1p(log_std + eps) + 1.0, jnp.exp(log_std))
    return mean, std


if __name__ == "__main__":
    B = 8
    input_dim = 16
    z_dim = 32

    key = jax.random.PRNGKey(0)
    k_param, k_x, k_h = jax.random.split(key, 3)

    params = _init_params(k_param, input_dim, z_dim)
    packed = _pack_params(params, input_dim, z_dim)

    x = jax.random.normal(k_x, (B, input_dim), jnp.float32)
    h = jax.random.normal(k_h, (B, z_dim), jnp.float32)

    mean, std = gated_transition_forward(x, h, packed, input_dim=input_dim, z_dim=z_dim)
    mean, std = jax.block_until_ready((mean, std))

    mean_ref, std_ref = _reference(x, h, params, z_dim)
    assert mean.shape == (B, z_dim) and std.shape == (B, z_dim)
    assert jnp.allclose(mean, mean_ref, atol=1e-5, rtol=1e-5)
    assert jnp.allclose(std, std_ref, atol=1e-5, rtol=1e-5)

    print("KERNEL_OK")
</pallas_src>

<mosaic_0001>
module attributes {stable_mosaic.version = 11 : i64} {
  func.func @_gated_transition_kernel(%arg0: i32, %arg1: memref<8x16xf32, #tpu.memory_space<vmem>>, %arg2: memref<8x32xf32, #tpu.memory_space<vmem>>, %arg3: memref<16x96xf32, #tpu.memory_space<vmem>>, %arg4: memref<32x96xf32, #tpu.memory_space<vmem>>, %arg5: memref<1x96xf32, #tpu.memory_space<vmem>>, %arg6: memref<1x96xf32, #tpu.memory_space<vmem>>, %arg7: memref<32x128xf32, #tpu.memory_space<vmem>>, %arg8: memref<1x128xf32, #tpu.memory_space<vmem>>, %arg9: memref<8x128xf32, #tpu.memory_space<vmem>>) attributes {dimension_semantics = [#tpu.dimension_semantics<parallel>], iteration_bounds = array<i64: 1>, scalar_prefetch = 0 : i64, scratch_operands = 0 : i64, tpu.core_type = #tpu.core_type<tc>, window_params = [{transform_indices = @transform_0, window_bounds = array<i64: 8, 16>}, {transform_indices = @transform_1, window_bounds = array<i64: 8, 32>}, {pipeline_mode = #tpu.pipeline_mode<synchronous>, transform_indices = @transform_2, window_bounds = array<i64: 16, 96>}, {pipeline_mode = #tpu.pipeline_mode<synchronous>, transform_indices = @transform_3, window_bounds = array<i64: 32, 96>}, {pipeline_mode = #tpu.pipeline_mode<synchronous>, transform_indices = @transform_4, window_bounds = array<i64: 1, 96>}, {pipeline_mode = #tpu.pipeline_mode<synchronous>, transform_indices = @transform_5, window_bounds = array<i64: 1, 96>}, {pipeline_mode = #tpu.pipeline_mode<synchronous>, transform_indices = @transform_6, window_bounds = array<i64: 32, 128>}, {pipeline_mode = #tpu.pipeline_mode<synchronous>, transform_indices = @transform_7, window_bounds = array<i64: 1, 128>}, {transform_indices = @transform_8, window_bounds = array<i64: 8, 128>}]} {
    %c0 = arith.constant 0 : index
    %c0_0 = arith.constant 0 : index
    %0 = vector.load %arg1[%c0, %c0_0] : memref<8x16xf32, #tpu.memory_space<vmem>>, vector<8x16xf32>
    %c0_1 = arith.constant 0 : index
    %c0_2 = arith.constant 0 : index
    %1 = vector.load %arg2[%c0_1, %c0_2] : memref<8x32xf32, #tpu.memory_space<vmem>>, vector<8x32xf32>
    %c0_3 = arith.constant 0 : index
    %c0_4 = arith.constant 0 : index
    %2 = vector.load %arg3[%c0_3, %c0_4] : memref<16x96xf32, #tpu.memory_space<vmem>>, vector<16x96xf32>
    %cst = arith.constant dense<0.000000e+00> : vector<8x96xf32>
    %3 = tpu.matmul %0, %2, %cst {dimension_numbers = #tpu.dot_dimension_numbers<[1], [0], [0], [1], [0, 0, 1, 1], [], []>} : vector<8x16xf32>, vector<16x96xf32>, vector<8x96xf32> -> vector<8x96xf32>
    %c0_5 = arith.constant 0 : index
    %c0_6 = arith.constant 0 : index
    %4 = vector.load %arg5[%c0_5, %c0_6] : memref<1x96xf32, #tpu.memory_space<vmem>>, vector<1x96xf32>
    %5 = vector.broadcast %4 : vector<1x96xf32> to vector<8x96xf32>
    %6 = arith.addf %3, %5 : vector<8x96xf32>
    %c0_7 = arith.constant 0 : index
    %c0_8 = arith.constant 0 : index
    %7 = vector.load %arg4[%c0_7, %c0_8] : memref<32x96xf32, #tpu.memory_space<vmem>>, vector<32x96xf32>
    %cst_9 = arith.constant dense<0.000000e+00> : vector<8x96xf32>
    %8 = tpu.matmul %1, %7, %cst_9 {dimension_numbers = #tpu.dot_dimension_numbers<[1], [0], [0], [1], [0, 0, 1, 1], [], []>} : vector<8x32xf32>, vector<32x96xf32>, vector<8x96xf32> -> vector<8x96xf32>
    %c0_10 = arith.constant 0 : index
    %c0_11 = arith.constant 0 : index
    %9 = vector.load %arg6[%c0_10, %c0_11] : memref<1x96xf32, #tpu.memory_space<vmem>>, vector<1x96xf32>
    %10 = vector.broadcast %9 : vector<1x96xf32> to vector<8x96xf32>
    %11 = arith.addf %8, %10 : vector<8x96xf32>
    %12 = vector.extract_strided_slice %6 {offsets = [0, 0], sizes = [8, 32], strides = [1, 1]} : vector<8x96xf32> to vector<8x32xf32>
    %13 = vector.extract_strided_slice %11 {offsets = [0, 0], sizes = [8, 32], strides = [1, 1]} : vector<8x96xf32> to vector<8x32xf32>
    %14 = arith.addf %12, %13 : vector<8x32xf32>
    %15 = arith.negf %14 : vector<8x32xf32>
    %16 = math.exp %15 : vector<8x32xf32>
    %cst_12 = arith.constant 1.000000e+00 : f32
    %17 = vector.broadcast %cst_12 : f32 to vector<8x32xf32>
    %18 = arith.addf %17, %16 : vector<8x32xf32>
    %19 = arith.divf %17, %18 : vector<8x32xf32>
    %20 = vector.extract_strided_slice %6 {offsets = [0, 32], sizes = [8, 32], strides = [1, 1]} : vector<8x96xf32> to vector<8x32xf32>
    %21 = vector.extract_strided_slice %11 {offsets = [0, 32], sizes = [8, 32], strides = [1, 1]} : vector<8x96xf32> to vector<8x32xf32>
    %22 = arith.addf %20, %21 : vector<8x32xf32>
    %23 = arith.negf %22 : vector<8x32xf32>
    %24 = math.exp %23 : vector<8x32xf32>
    %cst_13 = arith.constant 1.000000e+00 : f32
    %25 = vector.broadcast %cst_13 : f32 to vector<8x32xf32>
    %26 = arith.addf %25, %24 : vector<8x32xf32>
    %27 = arith.divf %25, %26 : vector<8x32xf32>
    %28 = vector.extract_strided_slice %6 {offsets = [0, 64], sizes = [8, 32], strides = [1, 1]} : vector<8x96xf32> to vector<8x32xf32>
    %29 = vector.extract_strided_slice %11 {offsets = [0, 64], sizes = [8, 32], strides = [1, 1]} : vector<8x96xf32> to vector<8x32xf32>
    %30 = arith.mulf %19, %29 : vector<8x32xf32>
    %31 = arith.addf %28, %30 : vector<8x32xf32>
    %32 = math.tanh %31 : vector<8x32xf32>
    %cst_14 = arith.constant 1.000000e+00 : f32
    %33 = vector.broadcast %cst_14 : f32 to vector<8x32xf32>
    %34 = arith.subf %33, %27 : vector<8x32xf32>
    %35 = arith.mulf %34, %32 : vector<8x32xf32>
    %36 = arith.mulf %27, %1 : vector<8x32xf32>
    %37 = arith.addf %35, %36 : vector<8x32xf32>
    %c0_15 = arith.constant 0 : index
    %c0_16 = arith.constant 0 : index
    %38 = vector.load %arg7[%c0_15, %c0_16] : memref<32x128xf32, #tpu.memory_space<vmem>>, vector<32x128xf32>
    %cst_17 = arith.constant dense<0.000000e+00> : vector<8x128xf32>
    %39 = tpu.matmul %37, %38, %cst_17 {dimension_numbers = #tpu.dot_dimension_numbers<[1], [0], [0], [1], [0, 0, 1, 1], [], []>} : vector<8x32xf32>, vector<32x128xf32>, vector<8x128xf32> -> vector<8x128xf32>
    %c0_18 = arith.constant 0 : index
    %c0_19 = arith.constant 0 : index
    %40 = vector.load %arg8[%c0_18, %c0_19] : memref<1x128xf32, #tpu.memory_space<vmem>>, vector<1x128xf32>
    %41 = vector.broadcast %40 : vector<1x128xf32> to vector<8x128xf32>
    %42 = arith.addf %39, %41 : vector<8x128xf32>
    %cst_20 = arith.constant 0.000000e+00 : f32
    %43 = vector.broadcast %cst_20 : f32 to vector<8x128xf32>
    %44 = arith.cmpf ogt, %42, %43 : vector<8x128xf32>
    %cst_21 = arith.constant 9.99999997E-7 : f32
    %45 = vector.broadcast %cst_21 : f32 to vector<8x128xf32>
    %46 = arith.addf %42, %45 : vector<8x128xf32>
    %47 = math.log1p %46 : vector<8x128xf32>
    %cst_22 = arith.constant 1.000000e+00 : f32
    %48 = vector.broadcast %cst_22 : f32 to vector<8x128xf32>
    %49 = arith.addf %47, %48 : vector<8x128xf32>
    %50 = math.exp %42 : vector<8x128xf32>
    %51 = arith.select %44, %49, %50 : vector<8x128xi1>, vector<8x128xf32>
    %52 = tpu.iota {dimensions = array<i32: 1>} : vector<8x128xi32>
    %c32_i32 = arith.constant 32 : i32
    %53 = vector.broadcast %c32_i32 : i32 to vector<8x128xi32>
    %54 = arith.cmpi slt, %52, %53 : vector<8x128xi32>
    %55 = arith.select %54, %42, %51 : vector<8x128xi1>, vector<8x128xf32>
    %c0_23 = arith.constant 0 : index
    %c0_24 = arith.constant 0 : index
    %56 = vector.load %arg9[%c0_23, %c0_24] : memref<8x128xf32, #tpu.memory_space<vmem>>, vector<8x128xf32>
    tpu.vector_store %arg9[%c0_23, %c0_24], %55 {strides = array<i32>} : memref<8x128xf32, #tpu.memory_space<vmem>>, vector<8x128xf32>,
    return
  }
  func.func @transform_0(%arg0: i32) -> (i32, i32) {
    %c0_i32 = arith.constant 0 : i32
    %c0_i32_0 = arith.constant 0 : i32
    return %arg0, %c0_i32 : i32, i32
  }
  func.func @transform_1(%arg0: i32) -> (i32, i32) {
    %c0_i32 = arith.constant 0 : i32
    %c0_i32_0 = arith.constant 0 : i32
    return %arg0, %c0_i32 : i32, i32
  }
  func.func @transform_2(%arg0: i32) -> (i32, i32) {
    %c0_i32 = arith.constant 0 : i32
    %c0_i32_0 = arith.constant 0 : i32
    %c0_i32_1 = arith.constant 0 : i32
    return %c0_i32, %c0_i32_0 : i32, i32
  }
  func.func @transform_3(%arg0: i32) -> (i32, i32) {
    %c0_i32 = arith.constant 0 : i32
    %c0_i32_0 = arith.constant 0 : i32
    %c0_i32_1 = arith.constant 0 : i32
    return %c0_i32, %c0_i32_0 : i32, i32
  }
  func.func @transform_4(%arg0: i32) -> (i32, i32) {
    %c0_i32 = arith.constant 0 : i32
    %c0_i32_0 = arith.constant 0 : i32
    %c0_i32_1 = arith.constant 0 : i32
    return %c0_i32, %c0_i32_0 : i32, i32
  }
  func.func @transform_5(%arg0: i32) -> (i32, i32) {
    %c0_i32 = arith.constant 0 : i32
    %c0_i32_0 = arith.constant 0 : i32
    %c0_i32_1 = arith.constant 0 : i32
    return %c0_i32, %c0_i32_0 : i32, i32
  }
  func.func @transform_6(%arg0: i32) -> (i32, i32) {
    %c0_i32 = arith.constant 0 : i32
    %c0_i32_0 = arith.constant 0 : i32
    %c0_i32_1 = arith.constant 0 : i32
    return %c0_i32, %c0_i32_0 : i32, i32
  }
  func.func @transform_7(%arg0: i32) -> (i32, i32) {
    %c0_i32 = arith.constant 0 : i32
    %c0_i32_0 = arith.constant 0 : i32
    %c0_i32_1 = arith.constant 0 : i32
    return %c0_i32, %c0_i32_0 : i32, i32
  }
  func.func @transform_8(%arg0: i32) -> (i32, i32) {
    %c0_i32 = arith.constant 0 : i32
    %c0_i32_0 = arith.constant 0 : i32
    return %arg0, %c0_i32 : i32, i32
  }
}

</mosaic_0001>

<bundles_post_ra>
// kernel: tpu_custom_call.1
= control target key start
LH: loop header
LB: loop body
LE: loop exit
PB: predicated region body
PF: predicated region fallthrough
CT: control target
= control target key end

     0   :  { %13 = vsyncpa [#allocation3], 0  ;;  %s798_s0 = inlined_call_operand.hbm [shape: f32[8,16], index: 0, kind: input, shape index: {}]   ;;  %s799_s1 = inlined_call_operand.hbm [shape: f32[8,32], index: 1, kind: input, shape index: {}]   ;;  %s800_s2 = inlined_call_operand.hbm [shape: f32[16,96], index: 2, kind: input, shape index: {}]   ;;  %s801_s3 = inlined_call_operand.hbm [shape: f32[32,96], index: 3, kind: input, shape index: {}]   ;;  %s802_s4 = inlined_call_operand.vmem [shape: f32[1,96], index: 4, kind: input, shape index: {}]   ;;  %s803_s5 = inlined_call_operand.vmem [shape: f32[1,96], index: 5, kind: input, shape index: {}]   ;;  %s804_s6 = inlined_call_operand.hbm [shape: f32[32,128], index: 6, kind: input, shape index: {}]   ;;  %s805_s7 = inlined_call_operand.vmem [shape: f32[1,128], index: 7, kind: input, shape index: {}]   ;;  %s806_s8 = inlined_call_operand.hbm [shape: f32[8,128], index: 8, kind: output, shape index: {}]  }
   0x1   :  { %14 = vsyncpa [#allocation6], 0 }
   0x2   :  { %15 = vsyncpa [#allocation9], 0 }
   0x3   :  { %16 = vsyncpa [#allocation4], 0  ;;  %s644_s27 = smov [#allocation5]   ;;  %s504_s9 = scalar_lea.hbm %s799_s1, 128 }
   0x4   :  { %s33_s28 = sshll.u32 %s644_s27, 4  ;;  %p505_p0 = scmp.ne.s32.totalorder %s799_s1, %s504_s9  ;;  %s34_s28 = int_to_ptr.vmem [resolvable:$true] %s33_s28 }
   0x5   :  { %p508_p1 = scmp.lt.u32.totalorder %s504_s9, %s799_s1 }
   0x7   :  { %p510_p2 = pnand %p508_p1, %p505_p0 }
   0x9   :  { %513 = shalt.err (!%p510_p2)
}
   0xa   :  { %s514_s14 = scalar_lea.vmem %s34_s28, 128  ;;  %p519_p4 = scmp.lt.s32.totalorder %s34_s28, %s34_s28 }
   0xb   :  { %p515_p3 = scmp.ne.s32.totalorder %s34_s28, %s514_s14  ;;  %p520_p5 = scmp.lt.s32.totalorder %s514_s14, %s514_s14 }
   0xd   :  { %p521_p6 = por %p520_p5, %p519_p4 }
   0xf   :  { %p522_p7 = pnand %p521_p6, %p515_p3 }
  0x11   :  { %525 = shalt.err (!%p522_p7)
}
  0x12   :  { %36 = dma.hbm_to_vmem [thread:$0]  %s799_s1, 128, %s34_s28, [#allocation6]  }
  0x13   :  { %s645_s17 = smov [#allocation8]   ;;  %s646_s19 = smov [#allocation2]  }
  0x14   :  { %s54_s18 = sshll.u32 %s645_s17, 4  ;;  %s23_s20 = sshll.u32 %s646_s19, 4  ;;  %s55_s18 = int_to_ptr.vmem [resolvable:$true] %s54_s18  ;;  %s24_s20 = int_to_ptr.vmem [resolvable:$true] %s23_s20 }
  0x15   :  { %s526_s23 = scalar_lea.hbm %s801_s3, 512 }
  0x16   :  { %p527_p8 = scmp.ne.s32.totalorder %s801_s3, %s526_s23  ;;  %p530_p9 = scmp.lt.u32.totalorder %s526_s23, %s801_s3 }
  0x18   :  { %p532_p10 = pnand %p530_p9, %p527_p8 }
  0x1a   :  { %535 = shalt.err (!%p532_p10)
}
  0x1b   :  { %s536_s1 = scalar_lea.vmem %s55_s18, 512  ;;  %p541_p12 = scmp.lt.s32.totalorder %s55_s18, %s55_s18 }
  0x1c   :  { %p537_p11 = scmp.ne.s32.totalorder %s55_s18, %s536_s1  ;;  %p542_p13 = scmp.lt.s32.totalorder %s536_s1, %s536_s1 }
  0x1e   :  { %p543_p0 = por %p542_p13, %p541_p12 }
  0x20   :  { %p544_p1 = pnand %p543_p0, %p537_p11 }
  0x22   :  { %547 = shalt.err (!%p544_p1)
}
  0x23   :  { %s647_s28 = smov 128   ;;  %s648_s29 = smov 8  }
  0x24   :  { %60 = dma.hbm_to_vmem [thread:$0]  %s801_s3, 512, %s55_s18, [#allocation9], %s647_s28, %s647_s28, %s648_s29  }
  0x25   :  { %s548_s12 = scalar_lea.hbm %s798_s0, 128 }
  0x26   :  { %p549_p2 = scmp.ne.s32.totalorder %s798_s0, %s548_s12  ;;  %p552_p3 = scmp.lt.u32.totalorder %s548_s12, %s798_s0 }
  0x28   :  { %p554_p4 = pnand %p552_p3, %p549_p2 }
  0x2a   :  { %557 = shalt.err (!%p554_p4)
}
  0x2b   :  { %s558_s17 = scalar_lea.vmem %s24_s20, 128  ;;  %p563_p6 = scmp.lt.s32.totalorder %s24_s20, %s24_s20 }
  0x2c   :  { %p559_p5 = scmp.ne.s32.totalorder %s24_s20, %s558_s17  ;;  %p564_p7 = scmp.lt.s32.totalorder %s558_s17, %s558_s17 }
  0x2e   :  { %p565_p8 = por %p564_p7, %p563_p6 }
  0x30   :  { %p566_p9 = pnand %p565_p8, %p559_p5 }
  0x32   :  { %569 = shalt.err (!%p566_p9)
}
  0x33   :  { %26 = dma.hbm_to_vmem [thread:$0]  %s798_s0, 128, %s24_s20, [#allocation3]  }
  0x34   :  { %s649_s19 = smov [#allocation7]   ;;  %s650_s22 = smov [#allocation10]  }
  0x35   :  { %s42_s21 = sshll.u32 %s649_s19, 4  ;;  %s70_s23 = sshll.u32 %s650_s22, 4  ;;  %s43_s21 = int_to_ptr.vmem [resolvable:$true] %s42_s21  ;;  %s71_s23 = int_to_ptr.vmem [resolvable:$true] %s70_s23 }
  0x36   :  { %s570_s26 = scalar_lea.hbm %s800_s2, 256 }
  0x37   :  { %p571_p10 = scmp.ne.s32.totalorder %s800_s2, %s570_s26  ;;  %p574_p11 = scmp.lt.u32.totalorder %s570_s26, %s800_s2 }
  0x39   :  { %p576_p12 = pnand %p574_p11, %p571_p10 }
  0x3b   :  { %579 = shalt.err (!%p576_p12)
}
  0x3c   :  { %s580_s0 = scalar_lea.vmem %s43_s21, 256  ;;  %p585_p0 = scmp.lt.s32.totalorder %s43_s21, %s43_s21 }
  0x3d   :  { %p581_p13 = scmp.ne.s32.totalorder %s43_s21, %s580_s0  ;;  %p586_p1 = scmp.lt.s32.totalorder %s580_s0, %s580_s0 }
  0x3f   :  { %p587_p2 = por %p586_p1, %p585_p0 }
  0x41   :  { %p588_p3 = pnand %p587_p2, %p581_p13 }
  0x43   :  { %591 = shalt.err (!%p588_p3)
}
  0x44   :  { %48 = dma.hbm_to_vmem [thread:$0]  %s800_s2, 256, %s43_s21, [#allocation6], %s647_s28, %s647_s28, %s648_s29  }
  0x45   :  { %s592_s13 = scalar_lea.hbm %s804_s6, 512 }
  0x46   :  { %p593_p4 = scmp.ne.s32.totalorder %s804_s6, %s592_s13  ;;  %p596_p5 = scmp.lt.u32.totalorder %s592_s13, %s804_s6 }
  0x48   :  { %p598_p6 = pnand %p596_p5, %p593_p4 }
  0x4a   :  { %601 = shalt.err (!%p598_p6)
}
  0x4b   :  { %s602_s3 = scalar_lea.vmem %s71_s23, 512  ;;  %p607_p8 = scmp.lt.s32.totalorder %s71_s23, %s71_s23 }
  0x4c   :  { %p603_p7 = scmp.ne.s32.totalorder %s71_s23, %s602_s3  ;;  %p608_p9 = scmp.lt.s32.totalorder %s602_s3, %s602_s3 }
  0x4e   :  { %p609_p10 = por %p608_p9, %p607_p8 }
  0x50   :  { %p610_p11 = pnand %p609_p10, %p603_p7 }
  0x52   :  { %613 = shalt.err (!%p610_p11)
}
  0x53   :  { %76 = dma.hbm_to_vmem [thread:$0]  %s804_s6, 512, %s71_s23, [#allocation9], %s647_s28, %s647_s28, %s648_s29  }
  0x54   :  { %636 = dma.done.wait [#allocation3], 128  }
  0x55   :  { %637 = vsyncadd [#allocation3], 4294967168 }
  0x56   :  { %638 = dma.done.wait [#allocation6], 384  }
  0x57   :  { %639 = vsyncadd [#allocation6], 4294966912 }
  0x58   :  { %640 = dma.done.wait [#allocation9], 1024  }
  0x59   :  { %641 = vsyncadd [#allocation9], 4294966272  ;;  %v651_v0 = vmov 0.0|0.0   ;;  %vm652_vm0 = vmmov 0   ;;  %v653_v1 = vmov 0.0   ;;  %v179_v2 = vld [vmem:[#allocation8] sm:$0xff]  ;;  %v394_v52 = vlaneseq }
  0x5a   :  { %468 = vmatprep.subr.bf16.mxu1 %v651_v0  ;;  %465 = vmatprep.subr.bf16.mxu0 %v651_v0  ;;  %v180_v3 = vld [vmem:[#allocation8 + $0x8] sm:$0xff]  ;;  %v96_v4 = vld [vmem:[#allocation7] sm:$0xff]  ;;  %v97_v6 = vld [vmem:[#allocation7 + $0x8] sm:$0xff]  ;;  %vm105_vm1 = vcmask 130048   ;;  %vm190_vm2 = vcmask 261120   ;;  %s654_s29 = smov 64  }
  0x5b   :  { %440 = vmatprep.mubr.msk.f32.mxu0 %vm652_vm0, %v653_v1  ;;  %451 = vmatprep.mubr.msk.f32.mxu1 %vm652_vm0, %v653_v1  ;;  %v469_v5 = vpack.c.bf16 %v180_v3, %v179_v2  ;;  %v181_v7 = vld [vmem:[#allocation8 + $0x10] sm:$0xff]  ;;  %v182_v8 = vld [vmem:[#allocation8 + $0x18] sm:$0xff]  ;;  %v466_v9 = vpack.c.bf16 %v97_v6, %v96_v4  ;;  %v94_v11 = vld [vmem:[#allocation2] sm:$0xff]  ;;  %v395_v56 = vand.u32 127, %v394_v52  ;;  %s657_s24 = smov [#allocation11]  }
  0x5c   :  { %v472_v10 = vpack.c.bf16 %v182_v8, %v181_v7  ;;  %v95_v12 = vld [vmem:[#allocation5] sm:$0xff]  ;;  %v418_v14 = vld [vmem:[%s803_s5] ss:$0 sm:$0xff]  ;;  %v295_v32 = vld [vmem:[#allocation10 + $0x10] sm:$0xff]  ;;  %s656_s5 = smov 32  }
  0x5d   :  { %470 = vmatpush3.bf16.msra.mxu1 %v469_v5  ;;  %467 = vmatpush3.bf16.msra.mxu0 %v466_v9  ;;  %v416_v19 = vld [vmem:[%s802_s4] ss:$0 sm:$0xff]  ;;  %v294_v31 = vld [vmem:[#allocation10 + $0x8] sm:$0xff]  ;;  %v296_v34 = vld [vmem:[#allocation10 + $0x18] sm:$0xff]  ;;  %s655_s4 = smov 96   ;;  %vm396_vm4 = vcmp.lt.s32.totalorder %v395_v56, 32 }
  0x5e   :  { %471 = vmatprep.subr.bf16.mxu1 %v651_v0  ;;  %474 = vmatprep.subr.bf16.mxu0 %v651_v0  ;;  %v293_v30 = vld [vmem:[#allocation10] sm:$0xff]  ;;  %v478_v35 = vpack.c.bf16 %v296_v34, %v295_v32 }
  0x5f   :  { %v475_v33 = vpack.c.bf16 %v294_v31, %v293_v30  ;;  %v421_v44 = vld [vmem:[%s805_s7] ss:$0 sm:$0xff]  ;;  %s405_s7 = sshll.u32 %s657_s24, 4  ;;  %s406_s7 = int_to_ptr.vmem [resolvable:$true] %s405_s7 }
  0x60   :  { %441 = vmatmul.mubr.msk.f32.vlgmr.msra.gmra.mrb[0].mxu0 %vm105_vm1, %v94_v11  ;;  %s614_s25 = scalar_lea.vmem %s406_s7, 128  ;;  %p619_p13 = scmp.lt.s32.totalorder %s406_s7, %s406_s7 }
  0x61   :  { %473 = vmatpush3.bf16.msra.mxu1 %v472_v10  ;;  %462 = vmatprep.mubr.msk.f32.mxu0 %vm652_vm0, %v653_v1  ;;  %p615_p12 = scmp.ne.s32.totalorder %s406_s7, %s614_s25  ;;  %p620_p0 = scmp.lt.s32.totalorder %s614_s25, %s614_s25 }
  0x62   :  { %476 = vmatpush3.bf16.msra.mxu0 %v475_v33 }
  0x63   :  { %477 = vmatprep.subr.bf16.mxu0 %v651_v0  ;;  %p621_p1 = por %p620_p0, %p619_p13 }
  0x64   :  { %452 = vmatmul.mubr.msk.f32.vlgmr.msra.gmra.mrb[0].mxu1 %vm190_vm2, %v95_v12 }
  0x65   :  { %p622_p2 = pnand %p621_p1, %p615_p12 }
  0x66   :  { %479 = vmatpush3.bf16.msra.mxu0 %v478_v35 }
 0x133   :  { %v175_v13 = vpop.f32.mrb[0].mxu0 }
 0x134   :  { %v442_v15 = vpop.f32.mrb[1].mxu0  ;;  %v176_v20 = vadd.f32 %v416_v19, %v175_v13 }
 0x137   :  { %v260_v16 = vpop.f32.mrb[0].mxu1 }
 0x138   :  { %v261_v17 = vadd.f32 %v418_v14, %v260_v16  ;;  %v453_v18 = vpop.f32.mrb[1].mxu1 }
 0x13a   :  { %272 = vrot.lane.b32.xlu0 %v261_v17, %s654_s29  ;;  %v264_v21 = vadd.f32 %v261_v17, %v176_v20 }
 0x13c   :  { %v420_v22 = vmul.f32 -1.442695, %v264_v21 }
 0x13e   :  { %494 = vpow2.f32 %v420_v22 }
 0x148   :  { %v495_v23 = vpop.eup %494 }
 0x149   :  { %v268_v24 = vadd.f32 1.0, %v495_v23 }
 0x14b   :  { %496 = vrcp.f32 %v268_v24 }
 0x155   :  { %v497_v25 = vpop.eup %496 }
 0x156   :  { %v282_v38 = vsub.f32 1.0, %v497_v25 }
 0x1ac   :  { %v273_v26 = vpop.permute.xlu0 %272 }
 0x1ad   :  { %v275_v27 = vmul.f32 %v497_v25, %v273_v26 }
 0x1af   :  { %277 = vrot.lane.b32.xlu0 %v275_v27, %s654_s29 }
 0x221   :  { %v278_v28 = vpop.permute.xlu0 %277 }
 0x222   :  { %v280_v29 = vadd.f32 %v278_v28, %v176_v20 }
 0x224   :  { %498 = vtanh.f32 %v280_v29 }
 0x22e   :  { %v499_v36 = vpop.eup %498 }
 0x22f   :  { %284 = vrot.lane.b32.xlu1 %v499_v36, %s655_s4 }
 0x233   :  { %288 = vrot.lane.b32.xlu1 %v95_v12, %s656_s5 }
 0x2a1   :  { %v285_v37 = vpop.permute.xlu1 %284 }
 0x2a2   :  { %v287_v40 = vmul.f32 %v285_v37, %v282_v38 }
 0x2a5   :  { %v289_v39 = vpop.permute.xlu1 %288 }
 0x2a6   :  { %v291_v41 = vmul.f32 %v497_v25, %v289_v39 }
 0x2a8   :  { %v292_v42 = vadd.f32 %v291_v41, %v287_v40 }
 0x2aa   :  { %305 = vrot.lane.b32.xlu0 %v292_v42, %s655_s4 }
 0x31c   :  { %v306_v43 = vpop.permute.xlu0 %305 }
 0x31d   :  { %463 = vmatmul.mubr.msk.f32.vlgmr.msra.gmra.mrb[2].mxu0 %vm190_vm2, %v306_v43 }
 0x3f0   :  { %v375_v45 = vpop.f32.mrb[2].mxu0 }
 0x3f1   :  { %v376_v46 = vadd.f32 %v421_v44, %v375_v45  ;;  %v464_v47 = vpop.f32.mrb[3].mxu0 }
 0x3f3   :  { %v380_v48 = vadd.f32 1e-06, %v376_v46  ;;  %v391_v50 = vmul.f32 1.442695, %v376_v46  ;;  %vm379_vm5 = vcmp.gt.f32.partialorder %v376_v46, 0.0 }
 0x3f5   :  { %v381_v49 = vadd.f32 1.0, %v380_v48  ;;  %v384_v51 = vmul.f32 -0.5, %v380_v48  ;;  %v387_v54 = vand.u32 2147483647, %v380_v48 }
 0x3f7   :  { %500 = vlog2.f32 %v381_v49  ;;  %v385_v53 = vadd.f32 1.0, %v384_v51  ;;  %vm388_vm3 = vcmp.lt.f32.partialorder %v387_v54, 0.0004427343 }
 0x3f8   :  { %502 = vpow2.f32 %v391_v50 }
 0x3f9   :  { %v386_v58 = vmul.f32 %v385_v53, %v380_v48 }
 0x401   :  { %v501_v55 = vpop.eup %500 }
 0x402   :  { %v383_v57 = vmul.f32 0.6931472, %v501_v55  ;;  %v503_v61 = vpop.eup %502 }
 0x404   :  { %v389_v59 = vsel %vm388_vm3, %v386_v58, %v383_v57 }
 0x405   :  { %v390_v60 = vadd.f32 1.0, %v389_v59 }
 0x407   :  { %v393_v62 = vsel %vm379_vm5, %v390_v60, %v503_v61 }
 0x408   :  { %v397_v63 = vsel %vm396_vm4, %v376_v46, %v393_v62 }
 0x409   :  { %398 = vst [vmem:[#allocation11] sm:$0xff] %v397_v63 }
 0x40a   :  { %625 = shalt.err (!%p622_p2)
}
 0x40b   :  { %s626_s1 = scalar_lea.hbm %s806_s8, 128 }
 0x40c   :  { %p627_p3 = scmp.ne.s32.totalorder %s806_s8, %s626_s1  ;;  %p630_p4 = scmp.lt.u32.totalorder %s626_s1, %s806_s8 }
 0x40e   :  { %p632_p5 = pnand %p630_p4, %p627_p3 }
 0x410   :  { %635 = shalt.err (!%p632_p5)
}
 0x411   :  { %408 = dma.vmem_to_hbm [thread:$0]  %s406_s7, 128, %s806_s8, [#allocation4]  }
 0x412   :  { %642 = dma.done.wait [#allocation4], 128  }
 0x413   :  { %643 = vsyncadd [#allocation4], 4294967168 }
 0x414   :  { %412 = vsyncpa [#allocation3], 1 }
 0x415   :  { %413 = vsyncpa [#allocation6], 1 }
 0x416   :  { %414 = vsyncpa [#allocation9], 1 }
 0x417   :  { %415 = vsyncpa [#allocation4], 1 }

</bundles_post_ra>
